<compile_context>
chip_gen: v7x
topology: tpu7x:2x2x1
jax: 0.10.0
libtpu: 0.0.40
codegen_flags: <defaults>
</compile_context>

<pallas_src>
import functools
import math

import jax
import jax.numpy as jnp
from jax import lax
from jax.experimental import pallas as pl
from jax.experimental.pallas import tpu as pltpu

EPS = 1e-5

# 48 MiB scoped VMEM: safe on v7x (64 MiB physical), well under v5e/v6e's 128 MiB physical,
# and explicitly larger than v5e's 16 MiB scoped default.
VMEM_LIMIT_BYTES = 48 * 1024 * 1024
# Per-block budget used when choosing tiles; leaves headroom under VMEM_LIMIT_BYTES for the
# compiler's internal scratch.
BLOCK_BUDGET_BYTES = 36 * 1024 * 1024


def _bytes_per_elem(itemsize):
    # 2x double-buffered input block + 2x double-buffered output block at the input dtype,
    # plus ~2 f32-sized in-kernel temporaries (x upcast to f32, y before the final cast).
    return 4 * itemsize + 8


def _largest_divisor_leq(n, cap, step):
    """Largest d with d % step == 0, d divides n, d <= cap (clamped to [step, n]); None if none."""
    cap = max(step, min(cap, n))
    d = (cap // step) * step
    while d >= step:
        if n % d == 0:
            return d
        d -= step
    return None


def _plan(B, N, F, itemsize, block_budget):
    """Return ("resident", b_tile, f_tile) or ("chunked", n_chunk, f_tile)."""
    bpe = _bytes_per_elem(itemsize)

    # Feature tile: prefer a full-F contiguous stripe; only tile F when it does not fit.
    if F % 128 != 0:
        # Block dim equal to the full array dim is always legal, even if lane-sparse.
        # TODO(synk): pad F to a multiple of 128 in the wrapper if this path is ever hot.
        ft = F
    elif N * F * bpe <= block_budget:
        ft = F
    else:
        ft = _largest_divisor_leq(F, max(128, block_budget // max(1, N * bpe)), 128)

    if ft is not None and N * ft * bpe <= block_budget:
        # Resident plan: whole N axis lives in VMEM; tile the batch as much as fits.
        bt = _largest_divisor_leq(B, max(1, block_budget // (N * ft * bpe)), 1) or 1
        # Guarantee >= 2 grid steps along a "parallel" axis when splittable (v7x has 2 TCs).
        if (B // bt) * (F // ft) == 1:
            if B > 1:
                bt = _largest_divisor_leq(B, B // 2, 1) or 1
            elif F % 256 == 0:
                ft = F // 2
        return ("resident", bt, ft)

    # Chunked plan (large N): reduce over N in chunks, second pass normalizes.
    if F % 128 == 0:
        ftc = _largest_divisor_leq(F, max(128, block_budget // (8 * bpe)), 128) or 128
    else:
        ftc = F
    nc = _largest_divisor_leq(N, max(8, block_budget // max(1, ftc * bpe)), 8)
    if nc is None:
        # N has no multiple-of-8 divisor: last-resort resident block.
        # TODO(synk): handle ragged N via a masked final chunk instead of this fallback.
        return ("resident", 1, ft if ft is not None else F)
    return ("chunked", nc, ftc)


def _in_resident_kernel(x_ref, w_ref, b_ref, o_ref):
    """Block = (B_TILE, N, F_TILE); w/b blocks = (1, F_TILE)."""
    x = x_ref[...].astype(jnp.float32)                       # (BT, N, FT)
    inv_n = jnp.float32(1.0 / x.shape[1])

    # Two-pass variance (block is VMEM-resident, so this is essentially free and matches
    # PyTorch's centered formulation for precision).
    mean = jnp.sum(x, axis=1, keepdims=True) * inv_n         # (BT, 1, FT)
    xc = x - mean
    var = jnp.sum(xc * xc, axis=1, keepdims=True) * inv_n    # biased variance
    inv_std = lax.rsqrt(var + EPS)

    scale = inv_std * w_ref[...][:, None, :]                 # (BT, 1, FT)
    o_ref[...] = (xc * scale + b_ref[...][:, None, :]).astype(o_ref.dtype)


def _in_chunked_kernel(x_ref, w_ref, b_ref, o_ref,
                       sum_ref, sq_ref, scale_ref, shift_ref,
                       *, n_total, n_chunks):
    """Grid = (B, F/FT, 2*n_chunks): first n_chunks steps accumulate stats, last n_chunks
    steps re-read x and write the normalized output.  x block = (1, N_CHUNK, FT)."""
    k = pl.program_id(2)

    @pl.when(k == 0)
    def _init():
        sum_ref[...] = jnp.zeros_like(sum_ref)
        sq_ref[...] = jnp.zeros_like(sq_ref)

    @pl.when(k < n_chunks)
    def _accumulate():
        x = x_ref[...].astype(jnp.float32)                   # (1, NC, FT)
        sum_ref[...] += jnp.sum(x, axis=1)                   # (1, FT)
        sq_ref[...] += jnp.sum(x * x, axis=1)

    @pl.when(k == n_chunks - 1)
    def _finalize_stats():
        # Single-pass E[x^2]-E[x]^2 in f32 (a centered second reduction pass would cost an
        # extra full read of x from HBM).
        inv_n = jnp.float32(1.0 / n_total)
        mean = sum_ref[...] * inv_n
        var = jnp.maximum(sq_ref[...] * inv_n - mean * mean, 0.0)
        inv_std = lax.rsqrt(var + EPS)
        scale = inv_std * w_ref[...]
        scale_ref[...] = scale
        shift_ref[...] = b_ref[...] - mean * scale

    @pl.when(k >= n_chunks)
    def _normalize():
        x = x_ref[...].astype(jnp.float32)
        y = x * scale_ref[...][:, None, :] + shift_ref[...][:, None, :]
        o_ref[...] = y.astype(o_ref.dtype)


def normalization_forward(x, weight, bias, *,
                          block_budget_bytes=BLOCK_BUDGET_BYTES,
                          vmem_limit_bytes=VMEM_LIMIT_BYTES):
    """x: (B, N, F); weight, bias: (F,).  Returns the InstanceNorm1d output, shape (B, N, F)."""
    B, N, F = x.shape
    itemsize = jnp.dtype(x.dtype).itemsize
    kind, tile, ft = _plan(B, N, F, itemsize, block_budget_bytes)

    w2 = weight.reshape(1, F).astype(jnp.float32)
    b2 = bias.reshape(1, F).astype(jnp.float32)

    if kind == "resident":
        bt = tile
        return pl.pallas_call(
            _in_resident_kernel,
            out_shape=jax.ShapeDtypeStruct((B, N, F), x.dtype),
            grid_spec=pltpu.PrefetchScalarGridSpec(
                num_scalar_prefetch=0,
                grid=(B // bt, F // ft),
                in_specs=[
                    pl.BlockSpec((bt, N, ft), lambda b, f: (b, 0, f)),
                    pl.BlockSpec((1, ft), lambda b, f: (0, f)),
                    pl.BlockSpec((1, ft), lambda b, f: (0, f)),
                ],
                out_specs=pl.BlockSpec((bt, N, ft), lambda b, f: (b, 0, f)),
            ),
            compiler_params=pltpu.CompilerParams(
                dimension_semantics=("parallel", "parallel"),
                vmem_limit_bytes=vmem_limit_bytes,
            ),
        )(x, w2, b2)

    # Chunked (large-N) path.
    ncs = tile
    n_chunks = N // ncs
    kernel = functools.partial(_in_chunked_kernel, n_total=N, n_chunks=n_chunks)

    def x_map(b, f, k):
        return (b, jnp.where(k < n_chunks, k, k - n_chunks), f)

    def o_map(b, f, k):
        return (b, jnp.maximum(k - n_chunks, 0), f)

    return pl.pallas_call(
        kernel,
        out_shape=jax.ShapeDtypeStruct((B, N, F), x.dtype),
        grid_spec=pltpu.PrefetchScalarGridSpec(
            num_scalar_prefetch=0,
            grid=(B, F // ft, 2 * n_chunks),
            in_specs=[
                pl.BlockSpec((1, ncs, ft), x_map),
                pl.BlockSpec((1, ft), lambda b, f, k: (0, f)),
                pl.BlockSpec((1, ft), lambda b, f, k: (0, f)),
            ],
            out_specs=pl.BlockSpec((1, ncs, ft), o_map),
            scratch_shapes=[
                pltpu.VMEM((1, ft), jnp.float32),   # sum
                pltpu.VMEM((1, ft), jnp.float32),   # sumsq
                pltpu.VMEM((1, ft), jnp.float32),   # scale
                pltpu.VMEM((1, ft), jnp.float32),   # shift
            ],
        ),
        compiler_params=pltpu.CompilerParams(
            dimension_semantics=("parallel", "parallel", "arbitrary"),
            vmem_limit_bytes=vmem_limit_bytes,
        ),
    )(x, w2, b2)


def init_params(key, embed_dim):
    # PyTorch init: uniform(-stdv, stdv), stdv = 1/sqrt(param.size(-1)) = 1/sqrt(embed_dim)
    stdv = 1.0 / math.sqrt(embed_dim)
    kw, kb = jax.random.split(key)
    weight = jax.random.uniform(kw, (embed_dim,), jnp.float32, -stdv, stdv)
    bias = jax.random.uniform(kb, (embed_dim,), jnp.float32, -stdv, stdv)
    return weight, bias


def reference_forward(x, weight, bias):
    # pure-JAX reference of InstanceNorm1d over the permuted input
    mean = jnp.mean(x, axis=1, keepdims=True)
    var = jnp.mean((x - mean) ** 2, axis=1, keepdims=True)
    y = (x - mean) / jnp.sqrt(var + EPS)
    return y * weight[None, None, :] + bias[None, None, :]


def _check(out, ref, shape):
    assert out.shape == shape
    assert jnp.allclose(out, ref, atol=1e-4, rtol=1e-4)


if __name__ == "__main__":
    key = jax.random.PRNGKey(0)
    keys = jax.random.split(key, 6)

    # 1) Small shape matching the module's toy usage (full-F, F%128 != 0 path).
    B1, N1, F1 = 2, 8, 32
    x1 = jax.random.normal(keys[0], (B1, N1, F1), jnp.float32)
    w1, b1 = init_params(keys[1], F1)
    out1 = jax.block_until_ready(normalization_forward(x1, w1, b1))
    _check(out1, reference_forward(x1, w1, b1), (B1, N1, F1))

    # 2) F multiple of 128: full-F lane-dense resident path with batch tiling.
    B2, N2, F2 = 4, 16, 256
    x2 = jax.random.normal(keys[2], (B2, N2, F2), jnp.float32)
    w2, b2 = init_params(keys[3], F2)
    out2 = jax.block_until_ready(normalization_forward(x2, w2, b2))
    _check(out2, reference_forward(x2, w2, b2), (B2, N2, F2))

    # 3) Force the large-N chunked-reduction path with an artificially tiny block budget.
    B3, N3, F3 = 2, 64, 256
    x3 = jax.random.normal(keys[4], (B3, N3, F3), jnp.float32)
    w3, b3 = init_params(keys[5], F3)
    out3 = jax.block_until_ready(
        normalization_forward(x3, w3, b3, block_budget_bytes=100_000))
    _check(out3, reference_forward(x3, w3, b3), (B3, N3, F3))

    print("KERNEL_OK")
</pallas_src>

<mosaic_0001>
module attributes {stable_mosaic.version = 11 : i64} {
  func.func @_in_resident_kernel(%arg0: i32, %arg1: i32, %arg2: memref<1x8x32xf32, #tpu.memory_space<vmem>>, %arg3: memref<1x32xf32, #tpu.memory_space<vmem>>, %arg4: memref<1x32xf32, #tpu.memory_space<vmem>>, %arg5: memref<1x8x32xf32, #tpu.memory_space<vmem>>) attributes {dimension_semantics = [#tpu.dimension_semantics<parallel>, #tpu.dimension_semantics<parallel>], iteration_bounds = array<i64: 2, 1>, scalar_prefetch = 0 : i64, scratch_operands = 0 : i64, tpu.core_type = #tpu.core_type<tc>, window_params = [{transform_indices = @transform_0, window_bounds = array<i64: 1, 8, 32>}, {transform_indices = @transform_1, window_bounds = array<i64: 1, 32>}, {transform_indices = @transform_2, window_bounds = array<i64: 1, 32>}, {transform_indices = @transform_3, window_bounds = array<i64: 1, 8, 32>}]} {
    %c0 = arith.constant 0 : index
    %c0_0 = arith.constant 0 : index
    %c0_1 = arith.constant 0 : index
    %0 = vector.load %arg2[%c0, %c0_0, %c0_1] : memref<1x8x32xf32, #tpu.memory_space<vmem>>, vector<1x8x32xf32>
    %cst = arith.constant dense<0.000000e+00> : vector<1x32xf32>
    %1 = vector.multi_reduction <add>, %0, %cst [1] : vector<1x8x32xf32> to vector<1x32xf32>
    %2 = vector.shape_cast %1 : vector<1x32xf32> to vector<1x1x32xf32>
    %cst_2 = arith.constant 1.250000e-01 : f32
    %3 = vector.broadcast %cst_2 : f32 to vector<1x1x32xf32>
    %4 = arith.mulf %2, %3 : vector<1x1x32xf32>
    %5 = vector.broadcast %4 : vector<1x1x32xf32> to vector<1x8x32xf32>
    %6 = arith.subf %0, %5 : vector<1x8x32xf32>
    %7 = arith.mulf %6, %6 : vector<1x8x32xf32>
    %cst_3 = arith.constant dense<0.000000e+00> : vector<1x32xf32>
    %8 = vector.multi_reduction <add>, %7, %cst_3 [1] : vector<1x8x32xf32> to vector<1x32xf32>
    %9 = vector.shape_cast %8 : vector<1x32xf32> to vector<1x1x32xf32>
    %cst_4 = arith.constant 1.250000e-01 : f32
    %10 = vector.broadcast %cst_4 : f32 to vector<1x1x32xf32>
    %11 = arith.mulf %9, %10 : vector<1x1x32xf32>
    %cst_5 = arith.constant 9.99999974E-6 : f32
    %12 = vector.broadcast %cst_5 : f32 to vector<1x1x32xf32>
    %13 = arith.addf %11, %12 : vector<1x1x32xf32>
    %14 = math.rsqrt %13 : vector<1x1x32xf32>
    %c0_6 = arith.constant 0 : index
    %c0_7 = arith.constant 0 : index
    %15 = vector.load %arg3[%c0_6, %c0_7] : memref<1x32xf32, #tpu.memory_space<vmem>>, vector<1x32xf32>
    %16 = vector.shape_cast %15 : vector<1x32xf32> to vector<1x1x32xf32>
    %17 = arith.mulf %14, %16 : vector<1x1x32xf32>
    %18 = vector.broadcast %17 : vector<1x1x32xf32> to vector<1x8x32xf32>
    %19 = arith.mulf %6, %18 : vector<1x8x32xf32>
    %c0_8 = arith.constant 0 : index
    %c0_9 = arith.constant 0 : index
    %20 = vector.load %arg4[%c0_8, %c0_9] : memref<1x32xf32, #tpu.memory_space<vmem>>, vector<1x32xf32>
    %21 = vector.shape_cast %20 : vector<1x32xf32> to vector<1x1x32xf32>
    %22 = vector.broadcast %21 : vector<1x1x32xf32> to vector<1x8x32xf32>
    %23 = arith.addf %19, %22 : vector<1x8x32xf32>
    %c0_10 = arith.constant 0 : index
    %c0_11 = arith.constant 0 : index
    %c0_12 = arith.constant 0 : index
    %24 = vector.load %arg5[%c0_10, %c0_11, %c0_12] : memref<1x8x32xf32, #tpu.memory_space<vmem>>, vector<1x8x32xf32>
    tpu.vector_store %arg5[%c0_10, %c0_11, %c0_12], %23 {strides = array<i32>} : memref<1x8x32xf32, #tpu.memory_space<vmem>>, vector<1x8x32xf32>,
    return
  }
  func.func @transform_0(%arg0: i32, %arg1: i32) -> (i32, i32, i32) {
    %c0_i32 = arith.constant 0 : i32
    %c0_i32_0 = arith.constant 0 : i32
    return %arg0, %c0_i32, %arg1 : i32, i32, i32
  }
  func.func @transform_1(%arg0: i32, %arg1: i32) -> (i32, i32) {
    %c0_i32 = arith.constant 0 : i32
    %c0_i32_0 = arith.constant 0 : i32
    return %c0_i32, %arg1 : i32, i32
  }
  func.func @transform_2(%arg0: i32, %arg1: i32) -> (i32, i32) {
    %c0_i32 = arith.constant 0 : i32
    %c0_i32_0 = arith.constant 0 : i32
    return %c0_i32, %arg1 : i32, i32
  }
  func.func @transform_3(%arg0: i32, %arg1: i32) -> (i32, i32, i32) {
    %c0_i32 = arith.constant 0 : i32
    %c0_i32_0 = arith.constant 0 : i32
    return %arg0, %c0_i32, %arg1 : i32, i32, i32
  }
}

</mosaic_0001>

<bundles_post_ra>
// kernel: tpu_custom_call.1
= control target key start
LH: loop header
LB: loop body
LE: loop exit
PB: predicated region body
PF: predicated region fallthrough
CT: control target
= control target key end

     0   :  { %8 = vsyncpa [#allocation3], 0  ;;  %s789_s0 = inlined_call_operand.hbm [shape: f32[2,8,32], index: 0, kind: input, shape index: {}]   ;;  %s790_s1 = inlined_call_operand.vmem [shape: f32[1,32], index: 1, kind: input, shape index: {}]   ;;  %s791_s2 = inlined_call_operand.vmem [shape: f32[1,32], index: 2, kind: input, shape index: {}]   ;;  %s792_s3 = inlined_call_operand.hbm [shape: f32[2,8,32], index: 3, kind: output, shape index: {}]  }
   0x1   :  { %10 = vsyncpa [#allocation3 + $0x1], 0 }
   0x2   :  { %11 = vsyncpa [#allocation4], 0 }
   0x3   :  { %13 = vsyncpa [#allocation4 + $0x1], 0  ;;  %s604_s12 = smov 0   ;;  %s606_s13 = smov 0  }
   0x4   :  { %s608_s14 = smov 0   ;;  %s610_s15 = smov 0  }
   0x5   :  { %s612_s16 = smov 0   ;;  %s614_s17 = smov 0  }
   0x6 LB: > { %s388_s18 = sadd.s32 4294967295, %s580_s17   ;;  %s389_s19 = sadd.s32 4294967294, %s580_s17   ;;  %s580_s17 = sphi %s614_s17, %s19_s17   ;;  %s576_s16 = sphi %s612_s16, %s808_s16   ;;  %s572_s15 = sphi %s610_s15, %s807_s15   ;;  %s568_s14 = sphi %s608_s14, %s806_s14   ;;  %s564_s13 = sphi %s606_s13, %s805_s13   ;;  %s560_s12 = sphi %s604_s12, %s804_s12  }
   0x7   : > { %s31_s20 = sadd.s32 1, %s576_s16  ;;  %s40_s21 = sadd.s32 1, %s568_s14 }
   0x8   : > { %p33_p0 = scmp.ge.s32.totalorder %s31_s20, 2  ;;  %p47_p1 = scmp.ne.s32.totalorder %s568_s14, %s564_s13 }
   0x9   : > { %p48_p2 = scmp.eq.s32.totalorder %s580_s17, 0  ;;  %p53_p3 = scmp.ne.s32.totalorder %s564_s13, %s560_s12 }
   0xa   : > { %s810_s20 = smov (%p33_p0, %s31_s20), 0  ;;  %p54_p5 = scmp.eq.s32.totalorder %s388_s18, 0 }
   0xb   : > { %p645_p4 = por %p48_p2, %p47_p1  ;;  %s35_s23 = ssub.s32 %s576_s16, %s810_s20 }
   0xc   : > { %p131_p6 = scmp.eq.s32.totalorder %s388_s18, 1  ;;  %p38_p7 = scmp.eq.s32.totalorder %s35_s23, 0 }
   0xd   : > { %p651_p8 = por %p54_p5, %p53_p3  ;;  %p137_p10 = scmp.eq.s32.totalorder %s389_s19, 1 }
   0xe   : > { %p655_p9 = por %p131_p6, %p47_p1  ;;  %p416_p13 = scmp.lt.s32.totalorder %s580_s17, 2 }
   0xf   : > { %s660_s26 = scalar_select %p38_p7, %s568_s14, %s40_s21  }
  0x10   : > { %s796_s25 = scalar_select %p655_p9, 1, 0 }
  0x11   : > { %p662_p11 = por %p137_p10, %p53_p3  ;;  %s169_s28 = sand.u32 1, %s568_s14  }
  0x12   : > { %s394_s29 = sshll.u32 %s169_s28, 3  ;;  %s395_s30 = sshll.u32 %s576_s16, 7 }
  0x13   : > { %s797_s27 = scalar_select %p662_p11, 1, 0 }
  0x14   : > { %s673_s6 = scalar_lea.hbm %s789_s0, %s395_s30  ;;  %s173_s7 = scalar_lea.vmem [#allocation2], %s394_s29 }
  0x15   : > { %s181_s8 = sshll.u32 %s173_s7, 4  ;;  %p679_p0 = pnand %p416_p13, %p645_p4  ;;  %s675_s8 = int_to_ptr.vmem [resolvable:$true] %s181_s8 }
  0x16   : > { %s170_s10 = scalar_lea.sflag [#allocation3], %s169_s28  ;;  %s468_s11 = scalar_lea.hbm %s673_s6, 128 }
  0x17   : > { %p469_p3 = scmp.ne.s32.totalorder %s673_s6, %s468_s11  ;;  %p470_p5 = pneg %p679_p0 }
  0x18   : > { %s473_s21 = scalar_lea.hbm %s789_s0, 256  ;;  %p474_p4 = scmp.lt.u32.totalorder %s673_s6, %s789_s0 }
  0x19   : > { %p471_p6 = pnand %p470_p5, %p469_p3  ;;  %p475_p10 = scmp.lt.u32.totalorder %s473_s21, %s468_s11 }
  0x1a   : > { %p477_p12 = scmp.lt.u32.totalorder %s468_s11, %s673_s6 }
  0x1b   : > { %p472_p7 = pneg %p471_p6  ;;  %p476_p13 = por %p475_p10, %p474_p4 }
  0x1d   : > { %p478_p1 = por %p477_p12, %p476_p13 }
  0x1f   : > { %p479_p2 = pnand %p478_p1, %p472_p7 }
  0x21   : > { %482 = shalt.err (!%p479_p2)
}
  0x22   : > { %s483_s28 = scalar_lea.vmem %s675_s8, 128  ;;  %s582_s29 = smov [#allocation2]  }
  0x23   : > { %p484_p3 = scmp.ne.s32.totalorder %s675_s8, %s483_s28  ;;  %s488_s30 = sshll.u32 %s582_s29, 4  ;;  %s489_s30 = int_to_ptr.vmem [resolvable:$false] %s488_s30 }
  0x24   : > { %s490_s4 = scalar_lea.vmem %s489_s30, 256  ;;  %p491_p9 = scmp.lt.s32.totalorder %s675_s8, %s489_s30 }
  0x25   : > { %p486_p6 = pnand %p484_p3, %p470_p5  ;;  %p492_p4 = scmp.lt.s32.totalorder %s490_s4, %s483_s28 }
  0x27   : > { %p487_p11 = pneg %p486_p6  ;;  %p493_p10 = por %p492_p4, %p491_p9 }
  0x29   : > { %p494_p12 = pnand %p493_p10, %p487_p11 }
  0x2b   : > { %497 = shalt.err (!%p494_p12)
}
  0x2c   : > { %411 = dma.hbm_to_vmem [thread:$0]  (!%p679_p0), %s673_s6, 128, %s675_s8, %s170_s10  }
  0x2d   : > { %p799_p1 = scmp.lt.s32.totalorder %s580_s17, 3  ;;  %p800_p2 = scmp.ge.s32.totalorder %s580_s17, 1 }
  0x2f   : > { %p187_p5 = pnand %p800_p2, %p799_p1 }
  0x30   : > { %s715_s5 = sand.u32 (!%p187_p5), 1, %s564_s13  }
  0x31   : > { %190 = sbr.rel (%p187_p5) target bundleno = 127 (0x7f), region = 32  ;;  %s397_s7 = sshll.u32 (!%p187_p5), %s715_s5, 3 }
  0x32   : > { %s193_s11 = scalar_lea.sflag (!%p187_p5), [#allocation3], %s715_s5  ;;  %s196_s9 = scalar_lea.vmem (!%p187_p5), [#allocation2], %s397_s7 }
  0x38   : > { %551 = dma.done.wait (%p651_p8), %s193_s11, 128  }
  0x39   : > { %553 = vsyncadd (%p651_p8), %s193_s11, 4294967168  ;;  %vm232_vm0 = vcmask 261120   ;;  %v231_v0 = vld [vmem:[%s196_s9] sm:$0xff]  ;;  %v255_v20 = vlaneseq  ;;  %s224_s18 = scalar_lea.vmem [#allocation5], %s397_s7  ;;  %s401_s21 = sshll.u32 %s572_s15, 7 }
  0x3a   : > { %v233_v1 = vsel %vm232_vm0, %v231_v0, 0.0  ;;  %v253_v22 = vld [vmem:[%s790_s1] sm:$0x1]  ;;  %s284_s19 = sshll.u32 %s224_s18, 4  ;;  %s741_s28 = scalar_lea.hbm %s792_s3, %s401_s21  ;;  %s736_s19 = int_to_ptr.vmem [resolvable:$true] %s284_s19 }
  0x3b   : > { %v234_v2 = vrot.slane %v233_v1, 4  ;;  %v256_v21 = vshrl.u32 %v255_v20, 7  ;;  %v399_v27 = vld [vmem:[%s791_s2] ss:$0 sm:$0xff]  ;;  %s270_s29 = scalar_lea.sflag [#allocation4], %s715_s5  ;;  %s498_s30 = scalar_lea.vmem %s736_s19, 128 }
  0x3c   : > { %p499_p8 = scmp.ne.s32.totalorder %s736_s19, %s498_s30  ;;  %p801_p9 = scmp.ne.s32.totalorder %s796_s25, 0 }
  0x3d   : > { %v235_v3 = vadd.f32 %v234_v2, %v233_v1  ;;  %v257_v23 = vsub.s32 0, %v256_v21  ;;  %s583_s15 = smov [#allocation5]  }
  0x3e   : > { %p500_p11 = pnand %p499_p8, %p801_p9  ;;  %s502_s4 = sshll.u32 %s583_s15, 4  ;;  %s503_s4 = int_to_ptr.vmem [resolvable:$false] %s502_s4 }
  0x3f   : > { %v236_v4 = vrot.slane %v235_v3, 2  ;;  %s504_s7 = scalar_lea.vmem %s503_s4, 256  ;;  %p505_p7 = scmp.lt.s32.totalorder %s736_s19, %s503_s4 }
  0x40   : > { %p501_p0 = pneg %p500_p11  ;;  %p506_p13 = scmp.lt.s32.totalorder %s504_s7, %s498_s30 }
  0x41   : > { %v237_v5 = vadd.f32 %v236_v4, %v235_v3 }
  0x42   : > { %p507_p3 = por %p506_p13, %p505_p7 }
  0x43   : > { %v238_v6 = vrot.slane %v237_v5, 1 }
  0x44   : > { %p508_p6 = pnand %p507_p3, %p501_p0 }
  0x45   : > { %v239_v7 = vadd.f32 %v238_v6, %v237_v5 }
  0x47   : > { %v240_v8 = vmul.f32 0.125, %v239_v7 }
  0x49   : > { %v241_v9 = vsub.f32 %v231_v0, %v240_v8 }
  0x4b   : > { %v242_v10 = vmul.f32 %v241_v9, %v241_v9 }
  0x4d   : > { %v243_v11 = vsel %vm232_vm0, %v242_v10, 0.0 }
  0x4e   : > { %v244_v12 = vrot.slane %v243_v11, 4 }
  0x50   : > { %v245_v13 = vadd.f32 %v244_v12, %v243_v11 }
  0x52   : > { %v246_v14 = vrot.slane %v245_v13, 2 }
  0x54   : > { %v247_v15 = vadd.f32 %v246_v14, %v245_v13 }
  0x56   : > { %v248_v16 = vrot.slane %v247_v15, 1 }
  0x58   : > { %v249_v17 = vadd.f32 %v248_v16, %v247_v15 }
  0x5a   : > { %v250_v18 = vmul.f32 0.125, %v249_v17 }
  0x5c   : > { %v251_v19 = vadd.f32 1e-05, %v250_v18 }
  0x5e   : > { %466 = vrsqrt.f32 %v251_v19 }
  0x68   : > { %v467_v24 = vpop.eup %466 }
  0x69   : > { %v254_v25 = vmul.f32 %v467_v24, %v253_v22 }
  0x6b   : > { %v258_v26 = vrot.slane %v254_v25, %v257_v23 }
  0x6d   : > { %v259_v28 = vmul.f32 %v258_v26, %v241_v9 }
  0x6f   : > { %v267_v29 = vadd.f32 %v399_v27, %v259_v28 }
  0x71   : > { %268 = vst.msk [vmem:[%s224_s18] sm:$0xff] %vm232_vm0, %v267_v29 }
  0x72   : > { %511 = shalt.err (!%p508_p6)
}
  0x73   : > { %s512_s5 = scalar_lea.hbm %s741_s28, 128  ;;  %s516_s24 = scalar_lea.hbm %s792_s3, 256 }
  0x74   : > { %p513_p4 = scmp.ne.s32.totalorder %s741_s28, %s512_s5  ;;  %p517_p1 = scmp.lt.u32.totalorder %s741_s28, %s792_s3 }
  0x75   : > { %p518_p2 = scmp.lt.u32.totalorder %s516_s24, %s512_s5  ;;  %p520_p8 = scmp.lt.u32.totalorder %s512_s5, %s741_s28 }
  0x76   : > { %p514_p10 = pnand %p513_p4, %p801_p9 }
  0x77   : > { %p519_p5 = por %p518_p2, %p517_p1 }
  0x78   : > { %p515_p12 = pneg %p514_p10 }
  0x79   : > { %p521_p11 = por %p520_p8, %p519_p5 }
  0x7b   : > { %p522_p0 = pnand %p521_p11, %p515_p12 }
  0x7d   : > { %525 = shalt.err (!%p522_p0)
}
  0x7e   : > { %406 = dma.vmem_to_hbm [thread:$0]  (%p801_p9), %s736_s19, 128, %s741_s28, %s270_s29  }
  0x7f PF: > { %s296_s10 = sand.u32 1, %s560_s12   ;;  %p802_p7 = scmp.ne.s32.totalorder %s797_s27, 0 }
  0x80   : > { %p803_p13 = scmp.ge.s32.totalorder %s580_s17, 2  ;;  %s297_s18 = scalar_lea.sflag [#allocation4], %s296_s10 }
  0x82   : > { %p413_p3 = pnand %p803_p13, %p802_p7 }
  0x84   : > { %555 = dma.done.wait (!%p413_p3), %s297_s18, 128  }
  0x85   : > { %557 = vsyncadd (!%p413_p3), %s297_s18, 4294967168  ;;  %s19_s17 = sadd.s32 1, %s580_s17   ;;  %s804_s12 = smov %s564_s13 }
  0x86   : > { %p16_p6 = scmp.ge.s32.totalorder %s19_s17, 4   ;;  %s805_s13 = smov %s568_s14 }
  0x87   : > { %s806_s14 = smov %s660_s26  ;;  %s807_s15 = smov %s576_s16 }
  0x88   : > { %s808_s16 = smov %s810_s20  ;;  %18 = sbr.rel (!%p16_p6) target bundleno = 6 (0x6), region = 83 }
  0x8f   :  { %302 = vsyncpa [#allocation3], 1 }
  0x90   :  { %304 = vsyncpa [#allocation3 + $0x1], 1 }
  0x91   :  { %305 = vsyncpa [#allocation4], 1 }
  0x92   :  { %307 = vsyncpa [#allocation4 + $0x1], 1 }

</bundles_post_ra>
